<compile_context>
chip_gen: v5e
topology: v5e:2x2
jax: 0.10.0
libtpu: 0.0.40
codegen_flags: <defaults>
</compile_context>

<pallas_src>
import jax
import jax.numpy as jnp
from jax.experimental import pallas as pl
from jax.experimental.pallas import tpu as pltpu


def linear_kernel(w_ref, b_ref, x_ref, o_ref):
    # w_ref: (in_f,) f32 in SMEM, b_ref: (1,) f32 in SMEM
    # x_ref: (in_f, TB) f32 in VMEM (batch on the lane axis)
    # o_ref: (1, TB)   f32 in VMEM (lane-dense output)
    x = x_ref[...]                       # (in_f, TB)
    in_f = x.shape[0]
    acc = x[0:1, :] * w_ref[0]           # VPU scalar multiply, no MXU
    for j in range(1, in_f):             # in_f is static & tiny (=2)
        acc = acc + x[j:j + 1, :] * w_ref[j]
    o_ref[...] = (acc + b_ref[0]).astype(o_ref.dtype)


def linear_net_forward(x, weight, bias, *, tb=512):
    """x: (B, in_f) f32, weight: (out_f, in_f) f32 (PyTorch layout), bias: (out_f,) f32.

    Returns (B, out_f) f32, matching PyTorch y = x @ W.T + b (out_f == 1 here).
    """
    B, in_f = x.shape
    out_f = weight.shape[0]
    assert out_f == 1, "LinearNet uses nn.Linear(2, 1)"

    # Lane-dense presentation: batch on the last (128-lane) axis.
    x_t = x.T                             # (in_f, B)
    w_flat = weight.reshape(-1).astype(x.dtype)   # (in_f,)  -> SMEM scalars
    b_flat = bias.reshape(-1).astype(x.dtype)     # (out_f,) -> SMEM scalar

    # Batch tiling: lane-aligned tiles for large B, single full block otherwise
    # (a block equal to the full array dims is exempt from the (8,128) rule).
    if B > tb and B % tb == 0:
        TB = tb
    else:
        TB = B
    n_tiles = B // TB

    y_t = pl.pallas_call(
        linear_kernel,
        out_shape=jax.ShapeDtypeStruct((out_f, B), x.dtype),
        grid=(n_tiles,),
        in_specs=[
            pl.BlockSpec(memory_space=pltpu.MemorySpace.SMEM),   # weight scalars
            pl.BlockSpec(memory_space=pltpu.MemorySpace.SMEM),   # bias scalar
            pl.BlockSpec((in_f, TB), lambda i: (0, i)),          # x tile (in_f, TB)
        ],
        out_specs=pl.BlockSpec((out_f, TB), lambda i: (0, i)),   # lane-dense output
        compiler_params=pltpu.CompilerParams(
            dimension_semantics=("parallel",)),                  # shard batch tiles across TCs
    )(w_flat, b_flat, x_t)

    return y_t.T                          # (B, out_f)


if __name__ == "__main__":
    key = jax.random.PRNGKey(0)
    kx, kw, kb, kx2 = jax.random.split(key, 4)

    # Deterministic Linear(2, 1) parameters (PyTorch shapes: W (1, 2), b (1,)).
    weight = jax.random.normal(kw, (1, 2), dtype=jnp.float32) * 0.5
    bias = jax.random.normal(kb, (1,), dtype=jnp.float32) * 0.5

    # Small-batch path (single block).
    B = 8
    x = jax.random.normal(kx, (B, 2), dtype=jnp.float32)
    y = linear_net_forward(x, weight, bias)
    jax.block_until_ready(y)
    y_ref = x @ weight.T + bias
    assert y.shape == (B, 1)
    assert jnp.allclose(y, y_ref, atol=1e-5), "mismatch vs reference (B=8)"

    # Tiled-batch path (grid over lane-aligned tiles).
    B2 = 1024
    x2 = jax.random.normal(kx2, (B2, 2), dtype=jnp.float32)
    y2 = linear_net_forward(x2, weight, bias, tb=512)
    jax.block_until_ready(y2)
    y2_ref = x2 @ weight.T + bias
    assert y2.shape == (B2, 1)
    assert jnp.allclose(y2, y2_ref, atol=1e-5), "mismatch vs reference (B=1024)"

    print("KERNEL_OK")
</pallas_src>

<mosaic_0001>
module attributes {stable_mosaic.version = 11 : i64} {
  func.func @linear_kernel(%arg0: i32, %arg1: memref<2xf32, #tpu.memory_space<smem>>, %arg2: memref<1xf32, #tpu.memory_space<smem>>, %arg3: memref<2x8xf32, #tpu.memory_space<vmem>>, %arg4: memref<1x8xf32, #tpu.memory_space<vmem>>) attributes {dimension_semantics = [#tpu.dimension_semantics<parallel>], iteration_bounds = array<i64: 1>, scalar_prefetch = 0 : i64, scratch_operands = 0 : i64, tpu.core_type = #tpu.core_type<tc>, window_params = [{transform_indices = @transform_0, window_bounds = array<i64: 2>}, {transform_indices = @transform_1, window_bounds = array<i64: 1>}, {transform_indices = @transform_2, window_bounds = array<i64: 2, 8>}, {transform_indices = @transform_3, window_bounds = array<i64: 1, 8>}]} {
    %c0 = arith.constant 0 : index
    %c0_0 = arith.constant 0 : index
    %0 = vector.load %arg3[%c0, %c0_0] : memref<2x8xf32, #tpu.memory_space<vmem>>, vector<2x8xf32>
    %1 = vector.extract_strided_slice %0 {offsets = [0, 0], sizes = [1, 8], strides = [1, 1]} : vector<2x8xf32> to vector<1x8xf32>
    %c0_1 = arith.constant 0 : index
    %2 = memref.load %arg1[%c0_1] : memref<2xf32, #tpu.memory_space<smem>>
    %3 = vector.broadcast %2 : f32 to vector<1x8xf32>
    %4 = arith.mulf %1, %3 : vector<1x8xf32>
    %5 = vector.extract_strided_slice %0 {offsets = [1, 0], sizes = [1, 8], strides = [1, 1]} : vector<2x8xf32> to vector<1x8xf32>
    %c1 = arith.constant 1 : index
    %6 = memref.load %arg1[%c1] : memref<2xf32, #tpu.memory_space<smem>>
    %7 = vector.broadcast %6 : f32 to vector<1x8xf32>
    %8 = arith.mulf %5, %7 : vector<1x8xf32>
    %9 = arith.addf %4, %8 : vector<1x8xf32>
    %c0_2 = arith.constant 0 : index
    %10 = memref.load %arg2[%c0_2] : memref<1xf32, #tpu.memory_space<smem>>
    %11 = vector.broadcast %10 : f32 to vector<1x8xf32>
    %12 = arith.addf %9, %11 : vector<1x8xf32>
    %c0_3 = arith.constant 0 : index
    %c0_4 = arith.constant 0 : index
    %13 = vector.load %arg4[%c0_3, %c0_4] : memref<1x8xf32, #tpu.memory_space<vmem>>, vector<1x8xf32>
    tpu.vector_store %arg4[%c0_3, %c0_4], %12 {strides = array<i32>} : memref<1x8xf32, #tpu.memory_space<vmem>>, vector<1x8xf32>,
    return
  }
  func.func @transform_0(%arg0: i32) -> i32 {
    %c0_i32 = arith.constant 0 : i32
    %c0_i32_0 = arith.constant 0 : i32
    return %c0_i32 : i32
  }
  func.func @transform_1(%arg0: i32) -> i32 {
    %c0_i32 = arith.constant 0 : i32
    %c0_i32_0 = arith.constant 0 : i32
    return %c0_i32 : i32
  }
  func.func @transform_2(%arg0: i32) -> (i32, i32) {
    %c0_i32 = arith.constant 0 : i32
    %c0_i32_0 = arith.constant 0 : i32
    return %c0_i32, %arg0 : i32, i32
  }
  func.func @transform_3(%arg0: i32) -> (i32, i32) {
    %c0_i32 = arith.constant 0 : i32
    %c0_i32_0 = arith.constant 0 : i32
    return %c0_i32, %arg0 : i32, i32
  }
}

</mosaic_0001>

<bundles_post_ra>
// kernel: tpu_custom_call.1
= control target key start
LH: loop header
LB: loop body
LE: loop exit
PB: predicated region body
PF: predicated region fallthrough
CT: control target
= control target key end

     0   :  { %9 = vsyncpa [#allocation5], 0  ;;  %s139_s0 = inlined_call_operand.hbm [shape: f32[2], index: 0, kind: input, shape index: {}]   ;;  %s140_s1 = inlined_call_operand.<no memory space> [shape: f32[1], index: 1, kind: input, shape index: {}]   ;;  %s141_s2 = inlined_call_operand.vmem [shape: f32[2,8], index: 2, kind: input, shape index: {}]   ;;  %s142_s3 = inlined_call_operand.hbm [shape: f32[1,8], index: 3, kind: output, shape index: {}]  }
   0x1   :  { %10 = vsyncpa [#allocation4], 0  ;;  %s16_s14 = sshll.u32 %s139_s0, 4  ;;  %s105_s15 = smov [#allocation3]   ;;  %s17_s14 = int_to_ptr.hbm [resolvable:$true] %s16_s14 }
   0x2   :  { %19 = dma.hbm_to_smem %s17_s14, 16, %s105_s15, [#allocation5]  }
   0x3   :  { %101 = dma.done.wait [#allocation5], 16  }
   0x4   :  { %102 = vsyncadd [#allocation5], 4294967280 }
   0x5   :  { %28 = sfence }
   0x6   :  { %s30_s16 = sld [smem:[#allocation3]]  ;;  %v29_v0 = vld [vmem:[%s141_s2] sm:$0x3]  ;;  %v41_v6 = vstv %s140_s1  ;;  %s106_s0 = smov [#allocation6]   ;;  %vm43_vm0 = vcmask 57344  }
   0x7   :  { %s62_s17 = sld [smem:[#allocation3 + $0x1]]  ;;  %s50_s22 = sshll.u32 %s106_s0, 4  ;;  %s51_s22 = int_to_ptr.vmem [resolvable:$true] %s50_s22 }
   0x8   :  { %s52_s25 = sshll.u32 %s142_s3, 4  ;;  %s53_s25 = int_to_ptr.hbm [resolvable:$true] %s52_s25 }
   0xc   :  { %v31_v1 = vstv %s30_s16 }
   0xd   :  { %v34_v2 = vstv %s62_s17  ;;  %v32_v3 = vmul.f32 %v31_v1, %v29_v0 }
   0xe   :  { %v35_v4 = vmul.f32 %v34_v2, %v29_v0 }
  0x10   :  { %v37_v5 = vrot.slane %v35_v4, 1 }
  0x12   :  { %v39_v7 = vadd.f32 %v37_v5, %v32_v3 }
  0x14   :  { %v42_v8 = vadd.f32 %v41_v6, %v39_v7 }
  0x16   :  { %44 = vst.msk [vmem:[#allocation6] sm:$0x1] %vm43_vm0, %v42_v8 }
  0x17   :  { %55 = dma.vmem_to_hbm [thread:$0]  %s51_s22, 16, %s53_s25, [#allocation4]  }
  0x18   :  { %103 = dma.done.wait [#allocation4], 16  }
  0x19   :  { %104 = vsyncadd [#allocation4], 4294967280 }
  0x1a   :  { %60 = vsyncpa [#allocation4], 1 }
  0x1b   :  { %61 = vsyncpa [#allocation5], 1 }

</bundles_post_ra>
